<compile_context>
chip_gen: v7x
topology: tpu7x:2x2x1
jax: 0.10.0
libtpu: 0.0.40
codegen_flags: <defaults>
</compile_context>

<pallas_src>
import jax
import jax.numpy as jnp
from jax.experimental import pallas as pl
from jax.experimental.pallas import tpu as pltpu


_TARGET_TILE_BYTES = 2 << 20  # ~2 MiB per buffer: fits v7x (64 MiB VMEM) with double buffering


def _pick_row_tile(rows, cols, elt_bytes):
    """Sublane (row) tile for elementwise paths: block (TR, cols)."""
    if rows <= 8:
        return rows
    tr = (_TARGET_TILE_BYTES // max(1, cols * elt_bytes)) // 8 * 8
    tr = max(8, tr)
    return min(rows, tr)  # either multiple of 8 or the full extent -> valid block dim


def _pick_lane_tile(lanes, rows, elt_bytes):
    """Lane tile for the batch-std path: block (rows, TL); full batch stays resident."""
    if lanes <= 128 or lanes % 128 != 0:
        return lanes  # full extent (always a valid block dim)
    tl = (_TARGET_TILE_BYTES // max(1, rows * elt_bytes)) // 128 * 128
    tl = max(128, tl)
    return min(lanes, tl)


# ----------------------------- kernel bodies ---------------------------------


def _sel_kernel_batch_std(x_ref, rand_ref, sel_ref, o_ref):
    """std computed over the batch axis in-kernel (training path, std_dev=None).

    Block shapes: x/rand/out (B, TL), sel (1, TL). Full batch resident per block,
    so the per-column unbiased std is exact.
    """
    x = x_ref[...].astype(jnp.float32)          # (B, TL)
    r = rand_ref[...].astype(jnp.float32)       # (B, TL)
    scale = jnp.exp(sel_ref[...].astype(jnp.float32))  # (1, TL) -> EUP, essentially free

    b = x.shape[0]
    mean = jnp.sum(x, axis=0, keepdims=True) * (1.0 / b)
    diff = x - mean
    # PyTorch .std(dim=0) is unbiased (divide by B-1). For B == 1 this yields NaN,
    # matching torch; runtime 0/0 rather than a trace-time ZeroDivisionError.
    var = jnp.sum(diff * diff, axis=0, keepdims=True) / jnp.float32(b - 1)
    std = jnp.sqrt(var)                          # (1, TL), broadcast over batch

    o_ref[...] = (x + (std * scale) * r).astype(o_ref.dtype)


def _sel_kernel_given_std(x_ref, rand_ref, sel_ref, std_ref, o_ref):
    """std_dev explicitly provided (prediction path). Pure elementwise.

    std_ref is either (1, TL) (row-broadcast / flattened path) or (TB, TL)
    (full per-element std); broadcasting handles both.
    """
    x = x_ref[...].astype(jnp.float32)
    r = rand_ref[...].astype(jnp.float32)
    scale = std_ref[...].astype(jnp.float32) * jnp.exp(sel_ref[...].astype(jnp.float32))
    o_ref[...] = (x + scale * r).astype(o_ref.dtype)


# ------------------------------- wrapper --------------------------------------


def selection_forward(x, rand, selectors, std_dev=None):
    """
    Args:
      x:         (B, L) latent representation.
      rand:      (B, L) standard-normal samples.
      selectors: (L,)   selection-neuron parameters.
      std_dev:   optional std; shape (L,), (1, L) or (B, L).
    Returns:
      (B, L) sample, same dtype as x.
    """
    B, L = x.shape
    elt = jnp.dtype(x.dtype).itemsize
    sel2d = selectors.reshape(1, L).astype(jnp.float32)
    cp = pltpu.CompilerParams(dimension_semantics=("parallel",))

    # ------------------------- training path: in-kernel batch std -------------------------
    if std_dev is None:
        tl = _pick_lane_tile(L, B, elt)
        # TODO(synk): for very large B where (B, TL) no longer fits VMEM, switch this path
        # to a two-axis grid with sum / sum-of-squares accumulators (pl.when init/finalize).
        return pl.pallas_call(
            _sel_kernel_batch_std,
            out_shape=jax.ShapeDtypeStruct((B, L), x.dtype),
            grid=(pl.cdiv(L, tl),),
            in_specs=[
                pl.BlockSpec((B, tl), lambda j: (0, j)),
                pl.BlockSpec((B, tl), lambda j: (0, j)),
                pl.BlockSpec((1, tl), lambda j: (0, j)),
            ],
            out_specs=pl.BlockSpec((B, tl), lambda j: (0, j)),
            compiler_params=cp,
        )(x, rand, sel2d)

    # ------------------------- prediction path: explicit std_dev --------------------------
    std = jnp.asarray(std_dev, dtype=jnp.float32)  # keep std in f32 (don't quantize to x.dtype)
    row_broadcast = (std.ndim == 1) or (std.ndim == 2 and std.shape[0] == 1)

    if row_broadcast:
        std2d = std.reshape(1, L)

        # Lane-dense flattened layout when L < 128 and the per-latent scale pattern
        # tiles evenly into a 128-lane row: avoids masked vst.msk partial stores.
        if L < 128 and 128 % L == 0 and (B * L) % 128 == 0:
            rep = 128 // L
            rows = (B * L) // 128
            x_f = x.reshape(rows, 128)        # contiguous reshape, no data movement
            r_f = rand.reshape(rows, 128)
            # Tiny (1, 128) parameter rows; exp() itself stays in-kernel (not pre-scaled).
            sel_f = jnp.tile(sel2d, (1, rep))
            std_f = jnp.tile(std2d, (1, rep))
            tr = _pick_row_tile(rows, 128, elt)
            out_f = pl.pallas_call(
                _sel_kernel_given_std,
                out_shape=jax.ShapeDtypeStruct((rows, 128), x.dtype),
                grid=(pl.cdiv(rows, tr),),
                in_specs=[
                    pl.BlockSpec((tr, 128), lambda i: (i, 0)),
                    pl.BlockSpec((tr, 128), lambda i: (i, 0)),
                    pl.BlockSpec((1, 128), lambda i: (0, 0)),
                    pl.BlockSpec((1, 128), lambda i: (0, 0)),
                ],
                out_specs=pl.BlockSpec((tr, 128), lambda i: (i, 0)),
                compiler_params=cp,
            )(x_f, r_f, sel_f, std_f)
            return out_f.reshape(B, L)

        # General row-broadcast std: tile over batch, std/selectors stay (1, L).
        tb = _pick_row_tile(B, L, elt)
        return pl.pallas_call(
            _sel_kernel_given_std,
            out_shape=jax.ShapeDtypeStruct((B, L), x.dtype),
            grid=(pl.cdiv(B, tb),),
            in_specs=[
                pl.BlockSpec((tb, L), lambda i: (i, 0)),
                pl.BlockSpec((tb, L), lambda i: (i, 0)),
                pl.BlockSpec((1, L), lambda i: (0, 0)),
                pl.BlockSpec((1, L), lambda i: (0, 0)),
            ],
            out_specs=pl.BlockSpec((tb, L), lambda i: (i, 0)),
            compiler_params=cp,
        )(x, rand, sel2d, std2d)

    # Full per-element std_dev (B, L): stream it like x / rand.
    tb = _pick_row_tile(B, L, elt)
    return pl.pallas_call(
        _sel_kernel_given_std,
        out_shape=jax.ShapeDtypeStruct((B, L), x.dtype),
        grid=(pl.cdiv(B, tb),),
        in_specs=[
            pl.BlockSpec((tb, L), lambda i: (i, 0)),
            pl.BlockSpec((tb, L), lambda i: (i, 0)),
            pl.BlockSpec((1, L), lambda i: (0, 0)),
            pl.BlockSpec((tb, L), lambda i: (i, 0)),
        ],
        out_specs=pl.BlockSpec((tb, L), lambda i: (i, 0)),
        compiler_params=cp,
    )(x, rand, sel2d, std)


# ------------------------------ pure-JAX reference -----------------------------


def selection_reference(x, rand, selectors, std_dev=None):
    sel = jnp.broadcast_to(selectors[None, :], x.shape)
    if std_dev is None:
        std = jnp.broadcast_to(jnp.std(x, axis=0, ddof=1)[None, :], x.shape)
    else:
        std = jnp.broadcast_to(jnp.asarray(std_dev, dtype=jnp.float32), x.shape)
    return x + std * jnp.exp(sel) * rand


if __name__ == "__main__":
    key = jax.random.PRNGKey(0)
    k1, k2, k3, k4, k5 = jax.random.split(key, 5)

    # Shapes consistent with the module: (batch, num_selectors).
    B, L = 8, 32
    # Module default init is -10 everywhere; use a spread of values for a meaningful check.
    selectors = jnp.linspace(-10.0, 0.0, L, dtype=jnp.float32)
    x = jax.random.normal(k1, (B, L), dtype=jnp.float32)
    rand = jax.random.normal(k2, (B, L), dtype=jnp.float32)

    # Path 1: training path (std over batch computed in-kernel, lane-tiled grid).
    out1 = jax.block_until_ready(selection_forward(x, rand, selectors))
    ref1 = selection_reference(x, rand, selectors)
    assert jnp.allclose(out1, ref1, atol=1e-5, rtol=1e-5), "batch-std path mismatch"

    # Path 2: prediction path, per-latent std (L,) -> lane-dense flattened kernel (L=32<128).
    std_vec = jnp.std(x, axis=0, ddof=1) * 1.5
    out2 = jax.block_until_ready(selection_forward(x, rand, selectors, std_dev=std_vec))
    ref2 = selection_reference(x, rand, selectors, std_dev=std_vec[None, :])
    assert jnp.allclose(out2, ref2, atol=1e-5, rtol=1e-5), "flat given-std path mismatch"

    # Path 3: prediction path with full per-element (B, L) std_dev.
    std_full = jnp.abs(jax.random.normal(k3, (B, L), dtype=jnp.float32)) + 0.1
    out3 = jax.block_until_ready(selection_forward(x, rand, selectors, std_dev=std_full))
    ref3 = selection_reference(x, rand, selectors, std_dev=std_full)
    assert jnp.allclose(out3, ref3, atol=1e-5, rtol=1e-5), "full given-std path mismatch"

    # Path 4: row-broadcast std at L that does not tile into 128 lanes -> 2-D row-tiled kernel.
    B2, L2 = 8, 160
    sel2 = jnp.linspace(-10.0, 0.0, L2, dtype=jnp.float32)
    x2 = jax.random.normal(k4, (B2, L2), dtype=jnp.float32)
    rand2 = jax.random.normal(k5, (B2, L2), dtype=jnp.float32)
    std2 = jnp.std(x2, axis=0, ddof=1)
    out4 = jax.block_until_ready(selection_forward(x2, rand2, sel2, std_dev=std2))
    ref4 = selection_reference(x2, rand2, sel2, std_dev=std2[None, :])
    assert jnp.allclose(out4, ref4, atol=1e-5, rtol=1e-5), "row given-std path mismatch"

    print("KERNEL_OK")
</pallas_src>

<mosaic_0001>
module attributes {stable_mosaic.version = 11 : i64} {
  func.func @_sel_kernel_batch_std(%arg0: i32, %arg1: memref<8x32xf32, #tpu.memory_space<vmem>>, %arg2: memref<8x32xf32, #tpu.memory_space<vmem>>, %arg3: memref<1x32xf32, #tpu.memory_space<vmem>>, %arg4: memref<8x32xf32, #tpu.memory_space<vmem>>) attributes {dimension_semantics = [#tpu.dimension_semantics<parallel>], iteration_bounds = array<i64: 1>, scalar_prefetch = 0 : i64, scratch_operands = 0 : i64, tpu.core_type = #tpu.core_type<tc>, window_params = [{transform_indices = @transform_0, window_bounds = array<i64: 8, 32>}, {transform_indices = @transform_1, window_bounds = array<i64: 8, 32>}, {transform_indices = @transform_2, window_bounds = array<i64: 1, 32>}, {transform_indices = @transform_3, window_bounds = array<i64: 8, 32>}]} {
    %c0 = arith.constant 0 : index
    %c0_0 = arith.constant 0 : index
    %0 = vector.load %arg1[%c0, %c0_0] : memref<8x32xf32, #tpu.memory_space<vmem>>, vector<8x32xf32>
    %c0_1 = arith.constant 0 : index
    %c0_2 = arith.constant 0 : index
    %1 = vector.load %arg2[%c0_1, %c0_2] : memref<8x32xf32, #tpu.memory_space<vmem>>, vector<8x32xf32>
    %c0_3 = arith.constant 0 : index
    %c0_4 = arith.constant 0 : index
    %2 = vector.load %arg3[%c0_3, %c0_4] : memref<1x32xf32, #tpu.memory_space<vmem>>, vector<1x32xf32>
    %3 = math.exp %2 : vector<1x32xf32>
    %cst = arith.constant dense<0.000000e+00> : vector<32xf32>
    %4 = vector.multi_reduction <add>, %0, %cst [0] : vector<8x32xf32> to vector<32xf32>
    %5 = vector.shape_cast %4 : vector<32xf32> to vector<1x32xf32>
    %cst_5 = arith.constant 1.250000e-01 : f32
    %6 = vector.broadcast %cst_5 : f32 to vector<1x32xf32>
    %7 = arith.mulf %5, %6 : vector<1x32xf32>
    %8 = vector.broadcast %7 : vector<1x32xf32> to vector<8x32xf32>
    %9 = arith.subf %0, %8 : vector<8x32xf32>
    %10 = arith.mulf %9, %9 : vector<8x32xf32>
    %cst_6 = arith.constant dense<0.000000e+00> : vector<32xf32>
    %11 = vector.multi_reduction <add>, %10, %cst_6 [0] : vector<8x32xf32> to vector<32xf32>
    %12 = vector.shape_cast %11 : vector<32xf32> to vector<1x32xf32>
    %cst_7 = arith.constant 7.000000e+00 : f32
    %13 = vector.broadcast %cst_7 : f32 to vector<1x32xf32>
    %14 = arith.divf %12, %13 : vector<1x32xf32>
    %15 = math.sqrt %14 : vector<1x32xf32>
    %16 = arith.mulf %15, %3 : vector<1x32xf32>
    %17 = vector.broadcast %16 : vector<1x32xf32> to vector<8x32xf32>
    %18 = arith.mulf %17, %1 : vector<8x32xf32>
    %19 = arith.addf %0, %18 : vector<8x32xf32>
    %c0_8 = arith.constant 0 : index
    %c0_9 = arith.constant 0 : index
    %20 = vector.load %arg4[%c0_8, %c0_9] : memref<8x32xf32, #tpu.memory_space<vmem>>, vector<8x32xf32>
    tpu.vector_store %arg4[%c0_8, %c0_9], %19 {strides = array<i32>} : memref<8x32xf32, #tpu.memory_space<vmem>>, vector<8x32xf32>,
    return
  }
  func.func @transform_0(%arg0: i32) -> (i32, i32) {
    %c0_i32 = arith.constant 0 : i32
    %c0_i32_0 = arith.constant 0 : i32
    return %c0_i32, %arg0 : i32, i32
  }
  func.func @transform_1(%arg0: i32) -> (i32, i32) {
    %c0_i32 = arith.constant 0 : i32
    %c0_i32_0 = arith.constant 0 : i32
    return %c0_i32, %arg0 : i32, i32
  }
  func.func @transform_2(%arg0: i32) -> (i32, i32) {
    %c0_i32 = arith.constant 0 : i32
    %c0_i32_0 = arith.constant 0 : i32
    return %c0_i32, %arg0 : i32, i32
  }
  func.func @transform_3(%arg0: i32) -> (i32, i32) {
    %c0_i32 = arith.constant 0 : i32
    %c0_i32_0 = arith.constant 0 : i32
    return %c0_i32, %arg0 : i32, i32
  }
}

</mosaic_0001>

<bundles_post_ra>
// kernel: tpu_custom_call.1
= control target key start
LH: loop header
LB: loop body
LE: loop exit
PB: predicated region body
PF: predicated region fallthrough
CT: control target
= control target key end

     0   :  { %8 = vsyncpa [#allocation3], 0  ;;  %s239_s0 = inlined_call_operand.hbm [shape: f32[8,32], index: 0, kind: input, shape index: {}]   ;;  %s240_s1 = inlined_call_operand.hbm [shape: f32[8,32], index: 1, kind: input, shape index: {}]   ;;  %s241_s2 = inlined_call_operand.vmem [shape: f32[1,32], index: 2, kind: input, shape index: {}]   ;;  %s242_s3 = inlined_call_operand.hbm [shape: f32[8,32], index: 3, kind: output, shape index: {}]  }
   0x1   :  { %9 = vsyncpa [#allocation6], 0 }
   0x2   :  { %10 = vsyncpa [#allocation4], 0  ;;  %s174_s12 = smov [#allocation2]   ;;  %s175_s14 = smov [#allocation5]  }
   0x3   :  { %s17_s13 = sshll.u32 %s174_s12, 4  ;;  %s27_s15 = sshll.u32 %s175_s14, 4  ;;  %s18_s13 = int_to_ptr.vmem [resolvable:$true] %s17_s13  ;;  %s28_s15 = int_to_ptr.vmem [resolvable:$true] %s27_s15 }
   0x4   :  { %s102_s18 = scalar_lea.hbm %s239_s0, 128 }
   0x5   :  { %p103_p0 = scmp.ne.s32.totalorder %s239_s0, %s102_s18  ;;  %p106_p1 = scmp.lt.u32.totalorder %s102_s18, %s239_s0 }
   0x7   :  { %p108_p2 = pnand %p106_p1, %p103_p0 }
   0x9   :  { %111 = shalt.err (!%p108_p2)
}
   0xa   :  { %s112_s23 = scalar_lea.vmem %s18_s13, 128  ;;  %p117_p4 = scmp.lt.s32.totalorder %s18_s13, %s18_s13 }
   0xb   :  { %p113_p3 = scmp.ne.s32.totalorder %s18_s13, %s112_s23  ;;  %p118_p5 = scmp.lt.s32.totalorder %s112_s23, %s112_s23 }
   0xd   :  { %p119_p6 = por %p118_p5, %p117_p4 }
   0xf   :  { %p120_p7 = pnand %p119_p6, %p113_p3 }
  0x11   :  { %123 = shalt.err (!%p120_p7)
}
  0x12   :  { %20 = dma.hbm_to_vmem [thread:$0]  %s239_s0, 128, %s18_s13, [#allocation3]  }
  0x13   :  { %s124_s28 = scalar_lea.hbm %s240_s1, 128 }
  0x14   :  { %p125_p8 = scmp.ne.s32.totalorder %s240_s1, %s124_s28  ;;  %p128_p9 = scmp.lt.u32.totalorder %s124_s28, %s240_s1 }
  0x16   :  { %p130_p10 = pnand %p128_p9, %p125_p8 }
  0x18   :  { %133 = shalt.err (!%p130_p10)
}
  0x19   :  { %s134_s6 = scalar_lea.vmem %s28_s15, 128  ;;  %p139_p12 = scmp.lt.s32.totalorder %s28_s15, %s28_s15 }
  0x1a   :  { %p135_p11 = scmp.ne.s32.totalorder %s28_s15, %s134_s6  ;;  %p140_p13 = scmp.lt.s32.totalorder %s134_s6, %s134_s6 }
  0x1c   :  { %p141_p0 = por %p140_p13, %p139_p12 }
  0x1e   :  { %p142_p1 = pnand %p141_p0, %p135_p11 }
  0x20   :  { %145 = shalt.err (!%p142_p1)
}
  0x21   :  { %30 = dma.hbm_to_vmem [thread:$0]  %s240_s1, 128, %s28_s15, [#allocation6]  }
  0x22   :  { %168 = dma.done.wait [#allocation3], 128  }
  0x23   :  { %169 = vsyncadd [#allocation3], 4294967168 }
  0x24   :  { %170 = dma.done.wait [#allocation6], 128  }
  0x25   :  { %171 = vsyncadd [#allocation6], 4294967168  ;;  %vm44_vm0 = vcmask 261120   ;;  %v39_v0 = vld [vmem:[#allocation2] sm:$0xff]  ;;  %v72_v21 = vlaneseq  ;;  %v40_v31 = vld [vmem:[#allocation5] sm:$0xff] }
  0x26   :  { %v45_v1 = vsel %vm44_vm0, %v39_v0, 0.0  ;;  %v41_v17 = vld [vmem:[%s241_s2] sm:$0x1]  ;;  %s176_s2 = smov [#allocation7]  }
  0x27   :  { %v46_v2 = vrot.slane %v45_v1, 4  ;;  %v42_v19 = vmul.f32 1.442695, %v41_v17  ;;  %v73_v22 = vshrl.u32 %v72_v21, 7  ;;  %s85_s9 = sshll.u32 %s176_s2, 4  ;;  %s86_s9 = int_to_ptr.vmem [resolvable:$true] %s85_s9 }
  0x28   :  { %s146_s10 = scalar_lea.vmem %s86_s9, 128  ;;  %p151_p3 = scmp.lt.s32.totalorder %s86_s9, %s86_s9 }
  0x29   :  { %v47_v3 = vadd.f32 %v46_v2, %v45_v1  ;;  %v74_v28 = vsub.s32 0, %v73_v22  ;;  %p147_p2 = scmp.ne.s32.totalorder %s86_s9, %s146_s10  ;;  %p152_p4 = scmp.lt.s32.totalorder %s146_s10, %s146_s10 }
  0x2b   :  { %v48_v4 = vrot.slane %v47_v3, 2  ;;  %p153_p5 = por %p152_p4, %p151_p3 }
  0x2d   :  { %v49_v5 = vadd.f32 %v48_v4, %v47_v3  ;;  %p154_p6 = pnand %p153_p5, %p147_p2 }
  0x2f   :  { %v50_v6 = vrot.slane %v49_v5, 1 }
  0x31   :  { %v51_v7 = vadd.f32 %v50_v6, %v49_v5 }
  0x33   :  { %v52_v8 = vmul.f32 0.125, %v51_v7 }
  0x35   :  { %v53_v9 = vsub.f32 %v39_v0, %v52_v8 }
  0x37   :  { %v54_v10 = vmul.f32 %v53_v9, %v53_v9 }
  0x39   :  { %v55_v11 = vsel %vm44_vm0, %v54_v10, 0.0 }
  0x3a   :  { %v56_v12 = vrot.slane %v55_v11, 4 }
  0x3c   :  { %v57_v13 = vadd.f32 %v56_v12, %v55_v11 }
  0x3e   :  { %v58_v14 = vrot.slane %v57_v13, 2 }
  0x40   :  { %v59_v15 = vadd.f32 %v58_v14, %v57_v13 }
  0x42   :  { %v60_v16 = vrot.slane %v59_v15, 1 }
  0x44   :  { %v61_v18 = vadd.f32 %v60_v16, %v59_v15 }
  0x46   :  { %v63_v20 = vmul.f32 0.14285715, %v61_v18 }
  0x48   :  { %98 = vrsqrt.f32 %v63_v20  ;;  %vm66_vm1 = vcmp.eq.f32.partialorder %v63_v20, inf  ;;  %v69_v24 = vand.u32 2147483648, %v63_v20  ;;  %vm68_vm2 = vcmp.eq.f32.partialorder %v63_v20, 0.0 }
  0x49   :  { %100 = vpow2.f32 %v42_v19 }
  0x52   :  { %v99_v23 = vpop.eup %98 }
  0x53   :  { %v65_v25 = vmul.f32 %v99_v23, %v63_v20  ;;  %v101_v26 = vpop.eup %100 }
  0x55   :  { %v67_v27 = vsel %vm66_vm1, %v63_v20, %v65_v25 }
  0x56   :  { %v70_v29 = vsel %vm68_vm2, %v69_v24, %v67_v27 }
  0x57   :  { %v71_v30 = vmul.f32 %v101_v26, %v70_v29 }
  0x59   :  { %v75_v32 = vrot.slane %v71_v30, %v74_v28 }
  0x5b   :  { %v76_v33 = vmul.f32 %v75_v32, %v40_v31 }
  0x5d   :  { %v77_v34 = vadd.f32 %v76_v33, %v39_v0 }
  0x5f   :  { %78 = vst.msk [vmem:[#allocation7] sm:$0xff] %vm44_vm0, %v77_v34 }
  0x60   :  { %157 = shalt.err (!%p154_p6)
}
  0x61   :  { %s158_s13 = scalar_lea.hbm %s242_s3, 128 }
  0x62   :  { %p159_p7 = scmp.ne.s32.totalorder %s242_s3, %s158_s13  ;;  %p162_p8 = scmp.lt.u32.totalorder %s158_s13, %s242_s3 }
  0x64   :  { %p164_p9 = pnand %p162_p8, %p159_p7 }
  0x66   :  { %167 = shalt.err (!%p164_p9)
}
  0x67   :  { %88 = dma.vmem_to_hbm [thread:$0]  %s86_s9, 128, %s242_s3, [#allocation4]  }
  0x68   :  { %172 = dma.done.wait [#allocation4], 128  }
  0x69   :  { %173 = vsyncadd [#allocation4], 4294967168 }
  0x6a   :  { %92 = vsyncpa [#allocation3], 1 }
  0x6b   :  { %93 = vsyncpa [#allocation6], 1 }
  0x6c   :  { %94 = vsyncpa [#allocation4], 1 }

</bundles_post_ra>
